<compile_context>
chip_gen: v7x
topology: tpu7x:2x2x1
jax: 0.10.0
libtpu: 0.0.40
codegen_flags: <defaults>
</compile_context>

<pallas_src>
import jax
import jax.numpy as jnp
from jax.experimental import pallas as pl
from jax.experimental.pallas import tpu as pltpu


def _frozen_bn_kernel(scale_ref, shift_ref, x_ref, o_ref):
    # scale/shift blocks: (TS, 1) float32; x/o blocks: (TS, TL).
    # One broadcast FMA over the lane axis, computed in f32, cast at store.
    x = x_ref[...].astype(jnp.float32)
    o_ref[...] = (x * scale_ref[...] + shift_ref[...]).astype(o_ref.dtype)


def _round_up(x, m):
    return (x + m - 1) // m * m


def frozen_batch_norm_2d(x, weight, bias, running_mean, running_var):
    """x: (N, C, H, W).  weight/bias/running_mean/running_var: (C,)."""
    N, C, H, W = x.shape
    L = H * W
    R = N * C

    # Per-channel affine in float32 (NO eps, matching the reference module:
    # weight * running_var.rsqrt()).
    scale_c = weight.astype(jnp.float32) * jax.lax.rsqrt(
        running_var.astype(jnp.float32))
    shift_c = bias.astype(jnp.float32) - running_mean.astype(jnp.float32) * scale_c

    # Flatten: (N*C) rows on the sublane axis, H*W on the lane axis.
    x2 = x.reshape(R, L)
    scale2 = jnp.tile(scale_c, N).reshape(R, 1)   # (R, 1) per-row scale (f32)
    shift2 = jnp.tile(shift_c, N).reshape(R, 1)   # (R, 1) per-row shift (f32)

    itemsize = x.dtype.itemsize
    # Packed sublane multiple: 8 for 32-bit, 16 for bf16/fp16, 32 for 8-bit.
    sub = 8 * max(1, 4 // max(1, itemsize))

    # Lane tile: large multiple of 128, capped at 2048; ragged edges are fine.
    TL = min(2048, _round_up(L, 128))

    # Row tile: as big as fits in ~4 MiB per block (double-buffered in+out
    # stays well within the 32 MiB scoped VMEM limit on every generation).
    max_block_bytes = 4 * 1024 * 1024
    ts_cap = max(sub, (max_block_bytes // (TL * itemsize)) // sub * sub)
    TS = min(ts_cap, _round_up(R, sub))

    # v7x dual-TC: if the lane axis has a single block, make sure the row
    # axis has enough blocks (>=4 when rows allow) so both cores get work.
    if pl.cdiv(L, TL) == 1 and pl.cdiv(R, TS) < 4:
        TS = max(sub, min(TS, _round_up(pl.cdiv(R, 4), sub)))

    grid = (pl.cdiv(R, TS), pl.cdiv(L, TL))
    param_spec = pl.BlockSpec((TS, 1), lambda i, j: (i, 0))

    out = pl.pallas_call(
        _frozen_bn_kernel,
        out_shape=jax.ShapeDtypeStruct((R, L), x.dtype),
        grid_spec=pltpu.PrefetchScalarGridSpec(
            num_scalar_prefetch=0,
            grid=grid,
            in_specs=[
                param_spec,                                   # scale (per row)
                param_spec,                                   # shift (per row)
                pl.BlockSpec((TS, TL), lambda i, j: (i, j)),  # x
            ],
            out_specs=pl.BlockSpec((TS, TL), lambda i, j: (i, j)),
        ),
        compiler_params=pltpu.CompilerParams(
            dimension_semantics=("parallel", "parallel"),
            vmem_limit_bytes=32 * 1024 * 1024,
        ),
    )(scale2, shift2, x2)

    return out.reshape(N, C, H, W)


def _reference(x, weight, bias, running_mean, running_var):
    scale = weight * jax.lax.rsqrt(running_var)
    shift = bias - running_mean * scale
    return x * scale.reshape(1, -1, 1, 1) + shift.reshape(1, -1, 1, 1)


if __name__ == "__main__":
    N, C, H, W = 2, 4, 16, 16

    key = jax.random.PRNGKey(0)
    kx, kw, kb, km, kv = jax.random.split(key, 5)

    x = jax.random.normal(kx, (N, C, H, W), dtype=jnp.float32)

    # FrozenBatchNorm2d buffers are (C,); use non-trivial values so the
    # affine broadcast is actually exercised (running_var strictly positive).
    weight = jax.random.normal(kw, (C,), dtype=jnp.float32) + 1.0
    bias = jax.random.normal(kb, (C,), dtype=jnp.float32)
    running_mean = jax.random.normal(km, (C,), dtype=jnp.float32)
    running_var = jax.random.uniform(
        kv, (C,), dtype=jnp.float32, minval=0.5, maxval=2.0)

    out = frozen_batch_norm_2d(x, weight, bias, running_mean, running_var)
    out = jax.block_until_ready(out)

    ref = _reference(x, weight, bias, running_mean, running_var)
    assert out.shape == (N, C, H, W)
    assert out.dtype == x.dtype
    assert jnp.allclose(out, ref, atol=1e-5, rtol=1e-5)

    # Also exercise an unaligned spatial size (ragged lane/row edge blocks).
    x2 = jax.random.normal(kx, (3, 5, 10, 10), dtype=jnp.float32)
    w2 = jax.random.normal(kw, (5,), dtype=jnp.float32) + 1.0
    b2 = jax.random.normal(kb, (5,), dtype=jnp.float32)
    m2 = jax.random.normal(km, (5,), dtype=jnp.float32)
    v2 = jax.random.uniform(kv, (5,), dtype=jnp.float32, minval=0.5, maxval=2.0)
    out2 = jax.block_until_ready(frozen_batch_norm_2d(x2, w2, b2, m2, v2))
    assert jnp.allclose(out2, _reference(x2, w2, b2, m2, v2), atol=1e-5, rtol=1e-5)

    print("KERNEL_OK")
</pallas_src>

<mosaic_0001>
module attributes {stable_mosaic.version = 11 : i64} {
  func.func @_frozen_bn_kernel(%arg0: i32, %arg1: i32, %arg2: memref<8x1xf32, #tpu.memory_space<vmem>>, %arg3: memref<8x1xf32, #tpu.memory_space<vmem>>, %arg4: memref<8x256xf32, #tpu.memory_space<vmem>>, %arg5: memref<8x256xf32, #tpu.memory_space<vmem>>) attributes {dimension_semantics = [#tpu.dimension_semantics<parallel>, #tpu.dimension_semantics<parallel>], iteration_bounds = array<i64: 1, 1>, scalar_prefetch = 0 : i64, scratch_operands = 0 : i64, tpu.core_type = #tpu.core_type<tc>, window_params = [{transform_indices = @transform_0, window_bounds = array<i64: 8, 1>}, {transform_indices = @transform_1, window_bounds = array<i64: 8, 1>}, {transform_indices = @transform_2, window_bounds = array<i64: 8, 256>}, {transform_indices = @transform_3, window_bounds = array<i64: 8, 256>}]} {
    %c0 = arith.constant 0 : index
    %c0_0 = arith.constant 0 : index
    %0 = vector.load %arg4[%c0, %c0_0] : memref<8x256xf32, #tpu.memory_space<vmem>>, vector<8x256xf32>
    %c0_1 = arith.constant 0 : index
    %c0_2 = arith.constant 0 : index
    %1 = vector.load %arg2[%c0_1, %c0_2] : memref<8x1xf32, #tpu.memory_space<vmem>>, vector<8x1xf32>
    %2 = vector.broadcast %1 : vector<8x1xf32> to vector<8x256xf32>
    %3 = arith.mulf %0, %2 : vector<8x256xf32>
    %c0_3 = arith.constant 0 : index
    %c0_4 = arith.constant 0 : index
    %4 = vector.load %arg3[%c0_3, %c0_4] : memref<8x1xf32, #tpu.memory_space<vmem>>, vector<8x1xf32>
    %5 = vector.broadcast %4 : vector<8x1xf32> to vector<8x256xf32>
    %6 = arith.addf %3, %5 : vector<8x256xf32>
    %c0_5 = arith.constant 0 : index
    %c0_6 = arith.constant 0 : index
    %7 = vector.load %arg5[%c0_5, %c0_6] : memref<8x256xf32, #tpu.memory_space<vmem>>, vector<8x256xf32>
    tpu.vector_store %arg5[%c0_5, %c0_6], %6 {strides = array<i32>} : memref<8x256xf32, #tpu.memory_space<vmem>>, vector<8x256xf32>,
    return
  }
  func.func @transform_0(%arg0: i32, %arg1: i32) -> (i32, i32) {
    %c0_i32 = arith.constant 0 : i32
    %c0_i32_0 = arith.constant 0 : i32
    return %arg0, %c0_i32 : i32, i32
  }
  func.func @transform_1(%arg0: i32, %arg1: i32) -> (i32, i32) {
    %c0_i32 = arith.constant 0 : i32
    %c0_i32_0 = arith.constant 0 : i32
    return %arg0, %c0_i32 : i32, i32
  }
  func.func @transform_2(%arg0: i32, %arg1: i32) -> (i32, i32) {
    %c0_i32 = arith.constant 0 : i32
    return %arg0, %arg1 : i32, i32
  }
  func.func @transform_3(%arg0: i32, %arg1: i32) -> (i32, i32) {
    %c0_i32 = arith.constant 0 : i32
    return %arg0, %arg1 : i32, i32
  }
}

</mosaic_0001>

<bundles_post_ra>
// kernel: tpu_custom_call.1
= control target key start
LH: loop header
LB: loop body
LE: loop exit
PB: predicated region body
PF: predicated region fallthrough
CT: control target
= control target key end

     0   :  { %s122_s0 = inlined_call_operand.vmem [shape: f32[8,1], index: 0, kind: input, shape index: {}]   ;;  %s123_s1 = inlined_call_operand.vmem [shape: f32[8,1], index: 1, kind: input, shape index: {}]   ;;  %s124_s2 = inlined_call_operand.vmem [shape: f32[8,256], index: 2, kind: input, shape index: {}]   ;;  %s125_s3 = inlined_call_operand.hbm [shape: f32[8,256], index: 3, kind: output, shape index: {}]  }
   0x1   :  { %v17_v0 = vld [vmem:[%s122_s0] sm:$0xff] }
   0x2   :  { %8 = vsyncpa [#allocation3], 0  ;;  %v76_v1 = vmov 0   ;;  %v25_v2 = vld [vmem:[%s123_s1] sm:$0xff]  ;;  %v16_v5 = vld [vmem:[%s124_s2 + $0x8] sm:$0xff]  ;;  %s77_s20 = smov [#allocation2]  }
   0x3   :  { %51 = vset.pattern.permute.xlu0 %v76_v1  ;;  %v15_v4 = vld [vmem:[%s124_s2] sm:$0xff]  ;;  %s41_s0 = sshll.u32 %s77_s20, 4  ;;  %s42_s0 = int_to_ptr.vmem [resolvable:$true] %s41_s0 }
   0x4   :  { %20 = vperm.xlu0 %51, %v17_v0   ;;  %s52_s1 = scalar_lea.vmem %s42_s0, 256  ;;  %p57_p1 = scmp.lt.s32.totalorder %s42_s0, %s42_s0 }
   0x5   :  { %p53_p0 = scmp.ne.s32.totalorder %s42_s0, %s52_s1  ;;  %p58_p2 = scmp.lt.s32.totalorder %s52_s1, %s52_s1 }
   0x7   :  { %p59_p3 = por %p58_p2, %p57_p1 }
   0x8   :  { %28 = vperm.xlu0 %51, %v25_v2  }
   0x9   :  { %p60_p4 = pnand %p59_p3, %p53_p0 }
  0x83   :  { %v21_v3 = vpop.permute.xlu0 %20 }
  0x84   :  { %v23_v6 = vmul.f32 %v21_v3, %v15_v4  ;;  %v24_v7 = vmul.f32 %v21_v3, %v16_v5 }
  0x87   :  { %v29_v8 = vpop.permute.xlu0 %28 }
  0x88   :  { %v31_v9 = vadd.f32 %v29_v8, %v23_v6  ;;  %v32_v10 = vadd.f32 %v29_v8, %v24_v7 }
  0x8a   :  { %33 = vst [vmem:[#allocation2] sm:$0xff] %v31_v9  ;;  %34 = vst [vmem:[#allocation2 + $0x8] sm:$0xff] %v32_v10 }
  0x8b   :  { %63 = shalt.err (!%p60_p4)
}
  0x8c   :  { %s64_s2 = scalar_lea.hbm %s125_s3, 256 }
  0x8d   :  { %p65_p5 = scmp.ne.s32.totalorder %s125_s3, %s64_s2  ;;  %p68_p6 = scmp.lt.u32.totalorder %s64_s2, %s125_s3 }
  0x8f   :  { %p70_p7 = pnand %p68_p6, %p65_p5 }
  0x91   :  { %73 = shalt.err (!%p70_p7)
}
  0x92   :  { %44 = dma.vmem_to_hbm [thread:$0]  %s42_s0, 256, %s125_s3, [#allocation3]  }
  0x93   :  { %74 = dma.done.wait [#allocation3], 256  }
  0x94   :  { %75 = vsyncadd [#allocation3], 4294967040 }
  0x95   :  { %48 = vsyncpa [#allocation3], 1 }

</bundles_post_ra>
